<compile_context>
chip_gen: v5e
topology: v5e:2x2
jax: 0.10.0
libtpu: 0.0.40
codegen_flags: <defaults>
</compile_context>

<pallas_src>
import functools

import jax
import jax.numpy as jnp
from jax import lax
from jax.experimental import pallas as pl
from jax.experimental.pallas import tpu as pltpu


def _round_up(n, m):
    return ((n + m - 1) // m) * m


def _mlp_kernel(x_ref, w1_ref, b1_ref, w2_ref, b2_ref, o_ref, *, b2_in_smem):
    # Layer 1 on the MXU (f32 in, f32 acc): contract x dim 1 with w1 dim 1,
    # i.e. x @ w1.T with w1 kept in PyTorch [out, in] layout (no transposes).
    h = lax.dot_general(
        x_ref[...], w1_ref[...],
        dimension_numbers=(((1,), (1,)), ((), ())),
        preferred_element_type=jnp.float32,
    )                                               # (tm, n_hidden) f32
    h = jnp.maximum(h + b1_ref[...], 0.0)           # f32 VPU epilogue (v5e-safe)

    # Layer 2, produced TRANSPOSED so the output is lane-dense: contract
    # w2 dim 1 with h dim 1 -> (n_output, tm); batch maps onto the lane axis,
    # so the store below is a full-width vst instead of masked 1-lane stores.
    o = lax.dot_general(
        w2_ref[...], h,
        dimension_numbers=(((1,), (1,)), ((), ())),
        preferred_element_type=jnp.float32,
    )                                               # (n_output, tm) f32

    if b2_in_smem:
        o = o + b2_ref[0]                           # scalar bias from SMEM
    else:
        o = o + b2_ref[...]                         # (n_output, 1) column broadcast

    o_ref[...] = o.astype(o_ref.dtype)


def prepare_params(w_hidden, b_hidden, w_predict, b_predict):
    """One-time parameter prep (call at init, NOT per forward).

    Keeps PyTorch [out, in] weight layouts untouched; shapes the biases so the
    kernel needs no per-step slices/reshapes:
      b1 -> (1, n_hidden) f32 row (broadcast over the batch tile)
      b2 -> (1,) f32 scalar (SMEM) when n_output == 1, else (n_output, 1) column.
    """
    w1 = jnp.asarray(w_hidden, jnp.float32)          # [n_hidden, n_feature]
    w2 = jnp.asarray(w_predict, jnp.float32)         # [n_output, n_hidden]
    b1 = jnp.asarray(b_hidden, jnp.float32).reshape(1, -1)
    b2 = jnp.asarray(b_predict, jnp.float32)
    n_output = w2.shape[0]
    b2 = b2.reshape(1) if n_output == 1 else b2.reshape(n_output, 1)
    return w1, b1, w2, b2


def net_forward(x, w1, b1, w2, b2, *, block_m=1024):
    """Pallas equivalent of Net.forward.

    x:  [batch, n_feature] float32
    w1: [n_hidden, n_feature]  (PyTorch Linear weight layout, untouched)
    b1: [1, n_hidden]
    w2: [n_output, n_hidden]
    b2: [1] (scalar, SMEM path) or [n_output, 1]
    returns: [batch, n_output] float32
    """
    x = jnp.asarray(x, jnp.float32)
    batch, n_feature = x.shape
    n_hidden = w1.shape[0]
    n_output = w2.shape[0]
    b2_in_smem = (b2.ndim == 1)

    # Batch tiling along the output LANE axis.  No padding of x: the grid
    # handles the ragged last block; only the small transposed output buffer is
    # over-allocated (num_tiles * tm lanes) and sliced in the wrapper.
    if batch <= 256:
        tm = max(8, _round_up(batch, 8))               # single grid step
    else:
        # >= 2 grid steps so v7x's second TensorCore gets work; tm multiple of
        # 128 keeps every (n_output, tm) output block lane-aligned.
        tm = max(128, min(block_m, _round_up(pl.cdiv(batch, 2), 128)))
    num_tiles = pl.cdiv(batch, tm)
    padded = num_tiles * tm

    if b2_in_smem:
        b2_spec = pl.BlockSpec(memory_space=pltpu.MemorySpace.SMEM)
    else:
        b2_spec = pl.BlockSpec((n_output, 1), lambda i: (0, 0))

    out_t = pl.pallas_call(
        functools.partial(_mlp_kernel, b2_in_smem=b2_in_smem),
        out_shape=jax.ShapeDtypeStruct((n_output, padded), jnp.float32),
        grid=(num_tiles,),
        in_specs=[
            pl.BlockSpec((tm, n_feature), lambda i: (i, 0)),        # x tile (pipelined)
            pl.BlockSpec((n_hidden, n_feature), lambda i: (0, 0)),  # w1 resident
            pl.BlockSpec((1, n_hidden), lambda i: (0, 0)),          # b1 resident
            pl.BlockSpec((n_output, n_hidden), lambda i: (0, 0)),   # w2 resident
            b2_spec,                                                # b2 (SMEM scalar)
        ],
        out_specs=pl.BlockSpec((n_output, tm), lambda i: (0, i)),   # lane-dense
        compiler_params=pltpu.CompilerParams(
            dimension_semantics=("parallel",)),  # megacore / v7x 2-TC sharding
    )(x, w1, b1, w2, b2)

    # (n_output, padded) -> (batch, n_output); tiny wrapper-side reshuffle.
    return out_t[:, :batch].T


def _reference(x, w_hidden, b_hidden, w_predict, b_predict):
    hi = jax.lax.Precision.HIGHEST
    h = jnp.maximum(jnp.matmul(x, w_hidden.T, precision=hi) + b_hidden, 0.0)
    return jnp.matmul(h, w_predict.T, precision=hi) + b_predict


if __name__ == "__main__":
    # Sizes implied by the module: Linear(n_feature, n_hidden), Linear(n_hidden, 1)
    batch, n_feature, n_hidden, n_output = 8, 16, 32, 1

    key = jax.random.PRNGKey(0)
    k1, k2, k3, k4, kx, kx2 = jax.random.split(key, 6)

    # PyTorch Linear default init: U(-1/sqrt(fan_in), 1/sqrt(fan_in))
    lim1 = 1.0 / jnp.sqrt(jnp.float32(n_feature))
    lim2 = 1.0 / jnp.sqrt(jnp.float32(n_hidden))
    w_hidden = jax.random.uniform(k1, (n_hidden, n_feature), jnp.float32, -lim1, lim1)
    b_hidden = jax.random.uniform(k2, (n_hidden,), jnp.float32, -lim1, lim1)
    w_predict = jax.random.uniform(k3, (n_output, n_hidden), jnp.float32, -lim2, lim2)
    b_predict = jax.random.uniform(k4, (n_output,), jnp.float32, -lim2, lim2)

    params = prepare_params(w_hidden, b_hidden, w_predict, b_predict)

    # Small batch (single grid step, exact-fit tile).
    x = jax.random.normal(kx, (batch, n_feature), jnp.float32)
    out = jax.block_until_ready(net_forward(x, *params))
    ref = _reference(x, w_hidden, b_hidden, w_predict, b_predict)
    assert out.shape == (batch, n_output)
    # f32 kernel math typically matches to ~1e-6; tolerance kept conservative to
    # stay robust to how the MXU configures its f32 passes across TPU gens.
    assert jnp.allclose(out, ref, atol=2e-2, rtol=1e-2), "mismatch (small batch)"

    # Larger, non-multiple-of-tile batch: 2-step parallel grid, ragged last
    # block, no wrapper-side jnp.pad of x.
    big_batch = 1000
    xb = jax.random.normal(kx2, (big_batch, n_feature), jnp.float32)
    outb = jax.block_until_ready(net_forward(xb, *params))
    refb = _reference(xb, w_hidden, b_hidden, w_predict, b_predict)
    assert outb.shape == (big_batch, n_output)
    assert jnp.allclose(outb, refb, atol=2e-2, rtol=1e-2), "mismatch (big batch)"

    print("KERNEL_OK")
</pallas_src>

<mosaic_0001>
module attributes {stable_mosaic.version = 11 : i64} {
  func.func @_mlp_kernel(%arg0: i32, %arg1: memref<8x16xf32, #tpu.memory_space<vmem>>, %arg2: memref<32x16xf32, #tpu.memory_space<vmem>>, %arg3: memref<1x32xf32, #tpu.memory_space<vmem>>, %arg4: memref<1x32xf32, #tpu.memory_space<vmem>>, %arg5: memref<1xf32, #tpu.memory_space<smem>>, %arg6: memref<1x8xf32, #tpu.memory_space<vmem>>) attributes {dimension_semantics = [#tpu.dimension_semantics<parallel>], iteration_bounds = array<i64: 1>, scalar_prefetch = 0 : i64, scratch_operands = 0 : i64, tpu.core_type = #tpu.core_type<tc>, window_params = [{transform_indices = @transform_0, window_bounds = array<i64: 8, 16>}, {pipeline_mode = #tpu.pipeline_mode<synchronous>, transform_indices = @transform_1, window_bounds = array<i64: 32, 16>}, {pipeline_mode = #tpu.pipeline_mode<synchronous>, transform_indices = @transform_2, window_bounds = array<i64: 1, 32>}, {pipeline_mode = #tpu.pipeline_mode<synchronous>, transform_indices = @transform_3, window_bounds = array<i64: 1, 32>}, {transform_indices = @transform_4, window_bounds = array<i64: 1>}, {transform_indices = @transform_5, window_bounds = array<i64: 1, 8>}]} {
    %c0 = arith.constant 0 : index
    %c0_0 = arith.constant 0 : index
    %0 = vector.load %arg1[%c0, %c0_0] : memref<8x16xf32, #tpu.memory_space<vmem>>, vector<8x16xf32>
    %c0_1 = arith.constant 0 : index
    %c0_2 = arith.constant 0 : index
    %1 = vector.load %arg2[%c0_1, %c0_2] : memref<32x16xf32, #tpu.memory_space<vmem>>, vector<32x16xf32>
    %cst = arith.constant dense<0.000000e+00> : vector<8x32xf32>
    %2 = tpu.matmul %0, %1, %cst {dimension_numbers = #tpu.dot_dimension_numbers<[1], [1], [0], [0], [0, 0, 1, 0], [], []>} : vector<8x16xf32>, vector<32x16xf32>, vector<8x32xf32> -> vector<8x32xf32>
    %c0_3 = arith.constant 0 : index
    %c0_4 = arith.constant 0 : index
    %3 = vector.load %arg3[%c0_3, %c0_4] : memref<1x32xf32, #tpu.memory_space<vmem>>, vector<1x32xf32>
    %4 = vector.broadcast %3 : vector<1x32xf32> to vector<8x32xf32>
    %5 = arith.addf %2, %4 : vector<8x32xf32>
    %cst_5 = arith.constant 0.000000e+00 : f32
    %6 = vector.broadcast %cst_5 : f32 to vector<8x32xf32>
    %7 = arith.maximumf %5, %6 : vector<8x32xf32>
    %c0_6 = arith.constant 0 : index
    %c0_7 = arith.constant 0 : index
    %8 = vector.load %arg4[%c0_6, %c0_7] : memref<1x32xf32, #tpu.memory_space<vmem>>, vector<1x32xf32>
    %cst_8 = arith.constant dense<0.000000e+00> : vector<1x8xf32>
    %9 = tpu.matmul %8, %7, %cst_8 {dimension_numbers = #tpu.dot_dimension_numbers<[1], [1], [0], [0], [0, 0, 1, 0], [], []>} : vector<1x32xf32>, vector<8x32xf32>, vector<1x8xf32> -> vector<1x8xf32>
    %c0_9 = arith.constant 0 : index
    %10 = memref.load %arg5[%c0_9] : memref<1xf32, #tpu.memory_space<smem>>
    %11 = vector.broadcast %10 : f32 to vector<1x8xf32>
    %12 = arith.addf %9, %11 : vector<1x8xf32>
    %c0_10 = arith.constant 0 : index
    %c0_11 = arith.constant 0 : index
    %13 = vector.load %arg6[%c0_10, %c0_11] : memref<1x8xf32, #tpu.memory_space<vmem>>, vector<1x8xf32>
    tpu.vector_store %arg6[%c0_10, %c0_11], %12 {strides = array<i32>} : memref<1x8xf32, #tpu.memory_space<vmem>>, vector<1x8xf32>,
    return
  }
  func.func @transform_0(%arg0: i32) -> (i32, i32) {
    %c0_i32 = arith.constant 0 : i32
    %c0_i32_0 = arith.constant 0 : i32
    return %arg0, %c0_i32 : i32, i32
  }
  func.func @transform_1(%arg0: i32) -> (i32, i32) {
    %c0_i32 = arith.constant 0 : i32
    %c0_i32_0 = arith.constant 0 : i32
    %c0_i32_1 = arith.constant 0 : i32
    return %c0_i32, %c0_i32_0 : i32, i32
  }
  func.func @transform_2(%arg0: i32) -> (i32, i32) {
    %c0_i32 = arith.constant 0 : i32
    %c0_i32_0 = arith.constant 0 : i32
    %c0_i32_1 = arith.constant 0 : i32
    return %c0_i32, %c0_i32_0 : i32, i32
  }
  func.func @transform_3(%arg0: i32) -> (i32, i32) {
    %c0_i32 = arith.constant 0 : i32
    %c0_i32_0 = arith.constant 0 : i32
    %c0_i32_1 = arith.constant 0 : i32
    return %c0_i32, %c0_i32_0 : i32, i32
  }
  func.func @transform_4(%arg0: i32) -> i32 {
    %c0_i32 = arith.constant 0 : i32
    %c0_i32_0 = arith.constant 0 : i32
    return %c0_i32 : i32
  }
  func.func @transform_5(%arg0: i32) -> (i32, i32) {
    %c0_i32 = arith.constant 0 : i32
    %c0_i32_0 = arith.constant 0 : i32
    return %c0_i32, %arg0 : i32, i32
  }
}

</mosaic_0001>

<bundles_post_ra>
// kernel: tpu_custom_call.1
= control target key start
LH: loop header
LB: loop body
LE: loop exit
PB: predicated region body
PF: predicated region fallthrough
CT: control target
= control target key end

     0   :  { %vm31_vm0 = vcmask 130048   ;;  %s209_s0 = inlined_call_operand.vmem [shape: f32[8,16], index: 0, kind: input, shape index: {}]   ;;  %s210_s1 = inlined_call_operand.vmem [shape: f32[32,16], index: 1, kind: input, shape index: {}]   ;;  %s211_s2 = inlined_call_operand.vmem [shape: f32[1,32], index: 2, kind: input, shape index: {}]   ;;  %s212_s3 = inlined_call_operand.vmem [shape: f32[1,32], index: 3, kind: input, shape index: {}]   ;;  %s213_s4 = inlined_call_operand.<no memory space> [shape: f32[1], index: 4, kind: input, shape index: {}]   ;;  %s214_s5 = inlined_call_operand.hbm [shape: f32[1,8], index: 5, kind: output, shape index: {}]  }
   0x1   :  { %v26_v0 = vld [vmem:[%s210_s1 + $0x18] sm:$0xff]  ;;  %v25_v1 = vld [vmem:[%s210_s1 + $0x10] sm:$0xff] }
   0x2   :  { %116 = vmatpush.xpose.msk.msra.mxu0 %vm31_vm0, %v26_v0 }
   0x3   :  { %11 = vsyncpa [#allocation4], 0  ;;  %v24_v2 = vld [vmem:[%s210_s1 + $0x8] sm:$0xff]  ;;  %v23_v3 = vld [vmem:[%s210_s1] sm:$0xff]  ;;  %vm71_vm1 = vcmask 261120   ;;  %v70_v10 = vstv %s213_s4  ;;  %vm98_vm2 = vcmask 57344  }
   0x4   :  { %v22_v4 = vld [vmem:[%s209_s0] sm:$0xff]  ;;  %s151_s0 = smov [#allocation3]  }
   0x5   :  { %v124_v5 = vld [vmem:[%s211_s2] ss:$0 sm:$0xff]  ;;  %s105_s8 = sshll.u32 %s151_s0, 4  ;;  %s107_s2 = sshll.u32 %s214_s5, 4  ;;  %s106_s8 = int_to_ptr.vmem [resolvable:$true] %s105_s8  ;;  %s108_s2 = int_to_ptr.hbm [resolvable:$true] %s107_s2 }
   0x6   :  { %117 = vmatpush.xpose.msk.msra.mxu0 %vm31_vm0, %v25_v1  ;;  %v68_v9 = vld [vmem:[%s212_s3] sm:$0x1] }
   0xa   :  { %118 = vmatpush.xpose.msk.msra.mxu0 %vm31_vm0, %v24_v2 }
   0xe   :  { %119 = vmatpush.xpose.msk.msra.mxu0 %vm31_vm0, %v23_v3 }
  0x11   :  { %120 = vmatmul.msk.f32.vlgmr.msra.gmra.mxu0 %vm31_vm0, %v22_v4 }
  0x8e   :  { %v64_v6 = vpop.f32.mrf.mxu0 }
  0x8f   :  { %v65_v7 = vadd.f32 %v124_v5, %v64_v6 }
  0x91   :  { %v67_v8 = vmax.f32 %v65_v7, 0.0 }
  0x93   :  { %121 = vmatpush.xpose.msk.msra.mxu1 %vm71_vm1, %v67_v8 }
  0x96   :  { %122 = vmatmul.msk.f32.vlgmr.msra.gmra.mxu1 %vm71_vm1, %v68_v9 }
 0x113   :  { %v95_v11 = vpop.f32.mrf.mxu1 }
 0x114   :  { %v96_v12 = vadd.f32 %v95_v11, %v70_v10 }
 0x116   :  { %99 = vst.msk [vmem:[#allocation3] sm:$0x1] %vm98_vm2, %v96_v12 }
 0x117   :  { %110 = dma.vmem_to_hbm [thread:$0]  %s106_s8, 16, %s108_s2, [#allocation4]  }
 0x118   :  { %149 = dma.done.wait [#allocation4], 16  }
 0x119   :  { %150 = vsyncadd [#allocation4], 4294967280 }
 0x11a   :  { %115 = vsyncpa [#allocation4], 1 }

</bundles_post_ra>
